<compile_context>
chip_gen: v5e
topology: v5e:2x2
jax: 0.10.0
libtpu: 0.0.40
codegen_flags: <defaults>
</compile_context>

<pallas_src>
import jax
import jax.numpy as jnp
from jax import lax
from jax.experimental import pallas as pl
from jax.experimental.pallas import tpu as pltpu


def _round_up(x, m):
    return (x + m - 1) // m * m


def _pick_tile(dim, candidates):
    """Largest candidate tile that divides `dim` (dim is a multiple of 128)."""
    for t in candidates:
        if dim % t == 0:
            return t
    return dim  # unreachable for 128-multiple dims, kept as a safe fallback


def _tensorcores_per_chip():
    """2 on v7x (megacore split pays off), 1 on v5e / v6e / unknown."""
    try:
        kind = jax.devices()[0].device_kind.lower().replace(" ", "")
    except Exception:
        return 1
    return 2 if ("v7" in kind or "tpu7" in kind or "7x" in kind) else 1


def _vmem_limit_bytes(budget):
    """Explicit scoped-VMEM budget with headroom; safe on v5e/v6e/v7x."""
    return int(min(max(budget * 3 // 2 + (4 << 20), 32 << 20), 60 << 20))


# ---------------------------------------------------------------------------
# Tiled matmul + bias (Stage A input projection, Stage C output projection).
# ---------------------------------------------------------------------------
def _matmul_bias_kernel_single_k(a_ref, b_ref, bias_ref, o_ref):
    # K fits in one block: no accumulator scratch, direct store.
    o_ref[...] = (jnp.dot(a_ref[...], b_ref[...],
                          preferred_element_type=jnp.float32)
                  + bias_ref[...].astype(jnp.float32)).astype(o_ref.dtype)


def _matmul_bias_kernel_multi_k(a_ref, b_ref, bias_ref, o_ref, acc_ref):
    @pl.when(pl.program_id(2) == 0)
    def _():
        acc_ref[...] = jnp.zeros_like(acc_ref)

    acc_ref[...] += jnp.dot(a_ref[...], b_ref[...],
                            preferred_element_type=jnp.float32)

    @pl.when(pl.program_id(2) == pl.num_programs(2) - 1)
    def _():
        o_ref[...] = (acc_ref[...] + bias_ref[...].astype(jnp.float32)
                      ).astype(o_ref.dtype)


def matmul_bias(a, b, bias, out_dtype, tm_pref=512, tn_pref=512, tk_pref=512):
    """a: (M, K) bf16, b: (K, N) bf16, bias: (1, N) f32 -> (M, N) out_dtype.

    All of M, N, K must be multiples of 128 (guaranteed by the wrapper's
    padding), so fixed {512,256,128} tiles always divide exactly."""
    M, K = a.shape
    K2, N = b.shape
    assert K == K2 and bias.shape == (1, N)
    assert M % 128 == 0 and N % 128 == 0 and K % 128 == 0

    tm = _pick_tile(M, (tm_pref, 256, 128))
    tn = _pick_tile(N, (tn_pref, 256, 128))
    tk = K if K <= tk_pref else _pick_tile(K, (tk_pref, 256, 128))
    nk = K // tk
    single_k = nk == 1

    kernel = _matmul_bias_kernel_single_k if single_k else _matmul_bias_kernel_multi_k
    scratch = [] if single_k else [pltpu.VMEM((tm, tn), jnp.float32)]

    out_itemsize = jnp.dtype(out_dtype).itemsize
    budget = 2 * (tm * tk * a.dtype.itemsize      # A blocks (double-buffered)
                  + tk * tn * b.dtype.itemsize    # B blocks
                  + tn * bias.dtype.itemsize      # bias blocks
                  + tm * tn * out_itemsize)       # output blocks
    if not single_k:
        budget += tm * tn * 4                      # f32 accumulator scratch

    return pl.pallas_call(
        kernel,
        out_shape=jax.ShapeDtypeStruct((M, N), out_dtype),
        grid_spec=pltpu.PrefetchScalarGridSpec(
            num_scalar_prefetch=0,
            grid=(M // tm, N // tn, nk),
            in_specs=[
                pl.BlockSpec((tm, tk), lambda i, j, k: (i, k)),
                pl.BlockSpec((tk, tn), lambda i, j, k: (k, j)),
                pl.BlockSpec((1, tn), lambda i, j, k: (0, j)),
            ],
            out_specs=pl.BlockSpec((tm, tn), lambda i, j, k: (i, j)),
            scratch_shapes=scratch,
        ),
        compiler_params=pltpu.CompilerParams(
            dimension_semantics=("parallel", "parallel", "arbitrary"),
            vmem_limit_bytes=_vmem_limit_bytes(budget)),
    )(a, b, bias)


# ---------------------------------------------------------------------------
# Serial tanh recurrence: h_t = tanh(pre_x_t + h_{t-1} @ W_hh^T).
# Only the (B, H) @ (H, H) matmul stays inside the sequential chain.
# ---------------------------------------------------------------------------
def _whh_block_spec(Hp):
    """Loop-invariant W_hh block; single-buffered when the API allows it."""
    idx = lambda b, t: (0, 0)
    if hasattr(pl, "Buffered"):
        try:
            return pl.BlockSpec((Hp, Hp), idx, pipeline_mode=pl.Buffered(1)), 1
        except TypeError:
            pass
    return pl.BlockSpec((Hp, Hp), idx), 2


def rnn_recurrence(pre_x, w_hh_t, num_tensorcores=1):
    """pre_x: (Tp, Bp, Hp) bf16 (already X@W_ih^T + biases).
    w_hh_t: (Hp, Hp) bf16.  Returns hidden states (Tp, Bp, Hp) bf16."""
    Tp, Bp, Hp = pre_x.shape

    # TT time steps per grid iteration (amortize ~0.35us per-step overhead).
    # Tp is padded to a multiple of 8 by the wrapper, so TT >= 8 always.
    TT = next(t for t in (32, 16, 8) if Tp % t == 0)

    # Split the batch across TensorCores only where 2 TCs exist (v7x); on
    # single-TC chips the split would just double the serial chain length.
    if num_tensorcores >= 2 and Bp % 32 == 0:
        BB = Bp // 2          # each core gets >= 16 sublane rows (bf16 tile)
    else:
        BB = Bp

    def kernel(px_ref, whh_ref, hs_ref, h_ref):
        # PyTorch nn.RNN with hx=None starts from a zero hidden state; reset
        # at the first time-block of every batch block.
        @pl.when(pl.program_id(1) == 0)
        def _():
            h_ref[...] = jnp.zeros_like(h_ref)

        def step(i, h):
            # pre_x is stored bf16; up-cast so the add+tanh path stays f32.
            pre = px_ref[i].astype(jnp.float32) + jnp.dot(
                h.astype(whh_ref.dtype), whh_ref[...],
                preferred_element_type=jnp.float32)
            h_new = jnp.tanh(pre)                       # f32 (EUP path)
            hs_ref[i] = h_new.astype(hs_ref.dtype)      # bf16 operand for W_out
            return h_new

        h_ref[...] = lax.fori_loop(0, TT, step, h_ref[...], unroll=True)

    whh_spec, whh_bufs = _whh_block_spec(Hp)
    budget = (2 * TT * BB * Hp * 2          # pre_x blocks (bf16)
              + whh_bufs * Hp * Hp * 2      # W_hh (bf16)
              + 2 * TT * BB * Hp * 2        # hidden-state output blocks (bf16)
              + BB * Hp * 4)                # f32 hidden carry scratch

    return pl.pallas_call(
        kernel,
        out_shape=jax.ShapeDtypeStruct((Tp, Bp, Hp), jnp.bfloat16),
        grid_spec=pltpu.PrefetchScalarGridSpec(
            num_scalar_prefetch=0,
            grid=(Bp // BB, Tp // TT),       # time axis iterates fastest
            in_specs=[
                pl.BlockSpec((TT, BB, Hp), lambda b, t: (t, b, 0)),
                whh_spec,                                # loop-invariant
            ],
            out_specs=pl.BlockSpec((TT, BB, Hp), lambda b, t: (t, b, 0)),
            scratch_shapes=[pltpu.VMEM((BB, Hp), jnp.float32)],  # hidden carry
        ),
        compiler_params=pltpu.CompilerParams(
            dimension_semantics=("parallel", "arbitrary"),
            vmem_limit_bytes=_vmem_limit_bytes(budget)),
    )(pre_x, w_hh_t)


# ---------------------------------------------------------------------------
# Full forward pass.
# ---------------------------------------------------------------------------
def lm_rnn_forward(tokens, params):
    """tokens: int32 (B, T).  Returns float32 (B, V, T)."""
    emb_table = params["emb"]           # (V, E) f32
    w_ih_t = params["w_ih_t"]           # (E, H)
    w_hh_t = params["w_hh_t"]           # (H, H)
    b = params["b"]                     # (1, H)  (= b_ih + b_hh)
    w_out_t = params["w_out_t"]         # (H, V)
    b_out = params["b_out"]             # (1, V)

    B, T = tokens.shape
    V, E = emb_table.shape
    H = w_hh_t.shape[0]

    n_tc = _tensorcores_per_chip()
    # Batch padded to 16 (packed bf16 (16,128) tiles); 32 when splitting over
    # the 2 TensorCores of v7x so each core still gets >= 16 sublane rows.
    Bp = _round_up(B, 32 if n_tc >= 2 else 16)
    # Time padded to a multiple of 8 so the recurrence never degrades to TT=1
    # and Tp*Bp is a multiple of 128 (dense-stage tiles always divide).
    Tp = _round_up(T, 8)
    Ep = _round_up(E, 128)
    Hp = _round_up(H, 128)
    Vp = _round_up(V, 128)

    # --- glue: embedding gather, time-major layout, tile padding -----------
    emb = jnp.take(emb_table, tokens, axis=0)            # (B, T, E)
    emb_tm = jnp.transpose(emb, (1, 0, 2))               # (T, B, E)
    emb_tm = jnp.pad(emb_tm, ((0, Tp - T), (0, Bp - B), (0, Ep - E)))
    x2d = emb_tm.reshape(Tp * Bp, Ep).astype(jnp.bfloat16)

    # Zero-padded weights (padding contributes exactly zero), bf16 MXU operands.
    w_ih_p = jnp.pad(w_ih_t, ((0, Ep - E), (0, Hp - H))).astype(jnp.bfloat16)
    w_hh_p = jnp.pad(w_hh_t, ((0, Hp - H), (0, Hp - H))).astype(jnp.bfloat16)
    b_p = jnp.pad(b, ((0, 0), (0, Hp - H)))                          # f32
    w_out_p = jnp.pad(w_out_t, ((0, Hp - H), (0, Vp - V))).astype(jnp.bfloat16)
    b_out_p = jnp.pad(b_out, ((0, 0), (0, Vp - V)))                  # f32

    # --- Stage A: dense input projection (parallel over Tp*Bp), bf16 out ---
    pre_x = matmul_bias(x2d, w_ih_p, b_p, jnp.bfloat16).reshape(Tp, Bp, Hp)

    # --- Stage B: serial tanh recurrence ------------------------------------
    hs = rnn_recurrence(pre_x, w_hh_p, num_tensorcores=n_tc)  # (Tp, Bp, Hp) bf16

    # --- Stage C: dense output projection (parallel over Tp*Bp), f32 out ---
    logits = matmul_bias(hs.reshape(Tp * Bp, Hp), w_out_p, b_out_p, jnp.float32)
    logits = logits.reshape(Tp, Bp, Vp)[:T, :B, :V]       # (T, B, V)

    # (T, B, V) -> (B, V, T)  ==  PyTorch output.permute(0, 2, 1).
    # XLA fuses the un-pad slice above and this transpose into one copy.
    return jnp.transpose(logits, (1, 2, 0))


def init_params(key, vocab_size, emb_size, hidden_size, pad_index=0):
    """Deterministic parameter init mirroring the module's shapes."""
    k = jax.random.split(key, 7)
    scale = 0.1
    emb = scale * jax.random.normal(k[0], (vocab_size, emb_size), jnp.float32)
    # nn.Embedding(padding_idx=pad_index) zeroes the pad row.
    emb = emb.at[pad_index].set(0.0)

    w_ih = scale * jax.random.normal(k[1], (hidden_size, emb_size), jnp.float32)
    w_hh = scale * jax.random.normal(k[2], (hidden_size, hidden_size), jnp.float32)
    b_ih = scale * jax.random.normal(k[3], (hidden_size,), jnp.float32)
    b_hh = scale * jax.random.normal(k[4], (hidden_size,), jnp.float32)
    w_out = scale * jax.random.normal(k[5], (vocab_size, hidden_size), jnp.float32)
    b_out = scale * jax.random.normal(k[6], (vocab_size,), jnp.float32)

    return {
        "emb": emb,
        "w_ih_t": w_ih.T,                       # (E, H)
        "w_hh_t": w_hh.T,                       # (H, H)
        "b": (b_ih + b_hh).reshape(1, hidden_size),
        "w_out_t": w_out.T,                     # (H, V)
        "b_out": b_out.reshape(1, vocab_size),
    }
    # TODO(synk): dropout layers are Identity (p=0.0 default) and the LSTM
    # branch (use_lstm=True) is not exercised; only the default RNN path is
    # implemented.


if __name__ == "__main__":
    B, T = 2, 8
    EMB, HID, VOCAB = 32, 32, 64
    PAD = 0

    key = jax.random.PRNGKey(0)
    pkey, tkey = jax.random.split(key)
    params = init_params(pkey, VOCAB, EMB, HID, pad_index=PAD)

    tokens = jax.random.randint(tkey, (B, T), 0, VOCAB, dtype=jnp.int32)

    out = lm_rnn_forward(tokens, params)        # (B, V, T)
    out = jax.block_until_ready(out)

    assert out.shape == (B, VOCAB, T), out.shape
    assert out.dtype == jnp.float32
    print("KERNEL_OK")
</pallas_src>

<mosaic_0001>
module attributes {stable_mosaic.version = 11 : i64} {
  func.func @_matmul_bias_kernel_single_k(%arg0: i32, %arg1: i32, %arg2: i32, %arg3: memref<128x128xbf16, #tpu.memory_space<vmem>>, %arg4: memref<128x128xbf16, #tpu.memory_space<vmem>>, %arg5: memref<1x128xf32, #tpu.memory_space<vmem>>, %arg6: memref<128x128xbf16, #tpu.memory_space<vmem>>) attributes {dimension_semantics = [#tpu.dimension_semantics<parallel>, #tpu.dimension_semantics<parallel>, #tpu.dimension_semantics<arbitrary>], iteration_bounds = array<i64: 1, 1, 1>, scalar_prefetch = 0 : i64, scratch_operands = 0 : i64, tpu.core_type = #tpu.core_type<tc>, window_params = [{transform_indices = @transform_0, window_bounds = array<i64: 128, 128>}, {transform_indices = @transform_1, window_bounds = array<i64: 128, 128>}, {transform_indices = @transform_2, window_bounds = array<i64: 1, 128>}, {transform_indices = @transform_3, window_bounds = array<i64: 128, 128>}]} {
    %c0 = arith.constant 0 : index
    %c0_0 = arith.constant 0 : index
    %0 = vector.load %arg3[%c0, %c0_0] : memref<128x128xbf16, #tpu.memory_space<vmem>>, vector<128x128xbf16>
    %c0_1 = arith.constant 0 : index
    %c0_2 = arith.constant 0 : index
    %1 = vector.load %arg4[%c0_1, %c0_2] : memref<128x128xbf16, #tpu.memory_space<vmem>>, vector<128x128xbf16>
    %cst = arith.constant dense<0.000000e+00> : vector<128x128xf32>
    %2 = tpu.matmul %0, %1, %cst {dimension_numbers = #tpu.dot_dimension_numbers<[1], [0], [0], [1], [0, 0, 1, 1], [], []>} : vector<128x128xbf16>, vector<128x128xbf16>, vector<128x128xf32> -> vector<128x128xf32>
    %c0_3 = arith.constant 0 : index
    %c0_4 = arith.constant 0 : index
    %3 = vector.load %arg5[%c0_3, %c0_4] : memref<1x128xf32, #tpu.memory_space<vmem>>, vector<1x128xf32>
    %4 = vector.broadcast %3 : vector<1x128xf32> to vector<128x128xf32>
    %5 = arith.addf %2, %4 : vector<128x128xf32>
    %6 = arith.truncf %5 : vector<128x128xf32> to vector<128x128xbf16>
    %c0_5 = arith.constant 0 : index
    %c0_6 = arith.constant 0 : index
    %7 = vector.load %arg6[%c0_5, %c0_6] : memref<128x128xbf16, #tpu.memory_space<vmem>>, vector<128x128xbf16>
    tpu.vector_store %arg6[%c0_5, %c0_6], %6 {strides = array<i32>} : memref<128x128xbf16, #tpu.memory_space<vmem>>, vector<128x128xbf16>,
    return
  }
  func.func @transform_0(%arg0: i32, %arg1: i32, %arg2: i32) -> (i32, i32) {
    %c0_i32 = arith.constant 0 : i32
    return %arg0, %arg2 : i32, i32
  }
  func.func @transform_1(%arg0: i32, %arg1: i32, %arg2: i32) -> (i32, i32) {
    %c0_i32 = arith.constant 0 : i32
    return %arg2, %arg1 : i32, i32
  }
  func.func @transform_2(%arg0: i32, %arg1: i32, %arg2: i32) -> (i32, i32) {
    %c0_i32 = arith.constant 0 : i32
    %c0_i32_0 = arith.constant 0 : i32
    return %c0_i32, %arg1 : i32, i32
  }
  func.func @transform_3(%arg0: i32, %arg1: i32, %arg2: i32) -> (i32, i32) {
    %c0_i32 = arith.constant 0 : i32
    return %arg0, %arg1 : i32, i32
  }
}

</mosaic_0001>

<bundles_post_ra>
// kernel: tpu_custom_call.1
= control target key start
LH: loop header
LB: loop body
LE: loop exit
PB: predicated region body
PF: predicated region fallthrough
CT: control target
= control target key end

     0   :  { %8 = vsyncpa [#allocation3], 0  ;;  %s561_s0 = inlined_call_operand.hbm [shape: bf16[128,128], index: 0, kind: input, shape index: {}]   ;;  %s562_s1 = inlined_call_operand.hbm [shape: bf16[128,128], index: 1, kind: input, shape index: {}]   ;;  %s563_s2 = inlined_call_operand.vmem [shape: f32[1,128], index: 2, kind: input, shape index: {}]   ;;  %s564_s3 = inlined_call_operand.hbm [shape: bf16[128,128], index: 3, kind: output, shape index: {}]  }
   0x1   :  { %9 = vsyncpa [#allocation6], 0 }
   0x2   :  { %10 = vsyncpa [#allocation4], 0  ;;  %s15_s14 = sshll.u32 %s561_s0, 4  ;;  %s515_s15 = smov [#allocation2]   ;;  %s16_s14 = int_to_ptr.hbm [resolvable:$true] %s15_s14 }
   0x3   :  { %s17_s16 = sshll.u32 %s515_s15, 4  ;;  %s28_s19 = sshll.u32 %s562_s1, 4  ;;  %s18_s16 = int_to_ptr.vmem [resolvable:$true] %s17_s16  ;;  %s29_s19 = int_to_ptr.hbm [resolvable:$true] %s28_s19 }
   0x4   :  { %s516_s20 = smov 64   ;;  %s517_s21 = smov 4  }
   0x5   :  { %23 = dma.hbm_to_vmem [thread:$0]  %s16_s14, 1024, %s18_s16, [#allocation3], %s516_s20, %s516_s20, %s517_s21  }
   0x6   :  { %s518_s22 = smov [#allocation5]  }
   0x7   :  { %s30_s23 = sshll.u32 %s518_s22, 4  ;;  %s31_s23 = int_to_ptr.vmem [resolvable:$true] %s30_s23 }
   0x8   :  { %36 = dma.hbm_to_vmem [thread:$0]  %s29_s19, 1024, %s31_s23, [#allocation6], %s516_s20, %s516_s20, %s517_s21  }
   0x9   :  { %509 = dma.done.wait [#allocation3], 1024  }
   0xa   :  { %510 = vsyncadd [#allocation3], 4294966272 }
   0xb   :  { %511 = dma.done.wait [#allocation6], 1024  }
   0xc   :  { %512 = vsyncadd [#allocation6], 4294966272  ;;  %v359_v0 = vld [vmem:[#allocation5 + $0x38] sm:$0xff]  ;;  %v358_v1 = vld [vmem:[#allocation5 + $0x30] sm:$0xff]  ;;  %s266_s27 = sshll.u32 %s564_s3, 4  ;;  %s267_s27 = int_to_ptr.hbm [resolvable:$true] %s266_s27 }
   0xd   :  { %179 = vmatpush.bf16.msra.mxu0 %v359_v0  ;;  %407 = vmatpush.bf16.msra.mxu1 %v359_v0  ;;  %v357_v2 = vld [vmem:[#allocation5 + $0x28] sm:$0xff]  ;;  %v356_v3 = vld [vmem:[#allocation5 + $0x20] sm:$0xff]  ;;  %v355_v4 = vld [vmem:[#allocation5 + $0x18] sm:$0xff] }
   0xe   :  { %408 = vmatpush.bf16.msra.mxu2 %v359_v0  ;;  %409 = vmatpush.bf16.msra.mxu3 %v359_v0  ;;  %v354_v5 = vld [vmem:[#allocation5 + $0x10] sm:$0xff]  ;;  %v353_v6 = vld [vmem:[#allocation5 + $0x8] sm:$0xff]  ;;  %v352_v7 = vld [vmem:[#allocation5] sm:$0xff] }
   0xf   :  { %v344_v8 = vld [vmem:[#allocation2] sm:$0xff]  ;;  %v346_v9 = vld [vmem:[#allocation2 + $0x10] sm:$0xff]  ;;  %v345_v12 = vld [vmem:[#allocation2 + $0x8] sm:$0xff] }
  0x10   :  { %v348_v10 = vld [vmem:[#allocation2 + $0x20] sm:$0xff]  ;;  %v350_v11 = vld [vmem:[#allocation2 + $0x30] sm:$0xff]  ;;  %v347_v13 = vld [vmem:[#allocation2 + $0x18] sm:$0xff] }
  0x11   :  { %180 = vmatpush.bf16.msra.mxu0 %v358_v1  ;;  %410 = vmatpush.bf16.msra.mxu1 %v358_v1  ;;  %v349_v14 = vld [vmem:[#allocation2 + $0x28] sm:$0xff]  ;;  %v351_v15 = vld [vmem:[#allocation2 + $0x38] sm:$0xff]  ;;  %v436_v18 = vld [vmem:[%s563_s2] ss:$0 sm:$0xff]  ;;  %s519_s2 = smov [#allocation7]  }
  0x12   :  { %411 = vmatpush.bf16.msra.mxu2 %v358_v1  ;;  %412 = vmatpush.bf16.msra.mxu3 %v358_v1  ;;  %s264_s24 = sshll.u32 %s519_s2, 4  ;;  %s265_s24 = int_to_ptr.vmem [resolvable:$true] %s264_s24 }
  0x15   :  { %181 = vmatpush.bf16.msra.mxu0 %v357_v2  ;;  %413 = vmatpush.bf16.msra.mxu1 %v357_v2 }
  0x16   :  { %414 = vmatpush.bf16.msra.mxu2 %v357_v2  ;;  %415 = vmatpush.bf16.msra.mxu3 %v357_v2 }
  0x19   :  { %182 = vmatpush.bf16.msra.mxu0 %v356_v3  ;;  %416 = vmatpush.bf16.msra.mxu1 %v356_v3 }
  0x1a   :  { %417 = vmatpush.bf16.msra.mxu2 %v356_v3  ;;  %418 = vmatpush.bf16.msra.mxu3 %v356_v3 }
  0x1d   :  { %183 = vmatpush.bf16.msra.mxu0 %v355_v4  ;;  %419 = vmatpush.bf16.msra.mxu1 %v355_v4 }
  0x1e   :  { %420 = vmatpush.bf16.msra.mxu2 %v355_v4  ;;  %421 = vmatpush.bf16.msra.mxu3 %v355_v4 }
  0x21   :  { %184 = vmatpush.bf16.msra.mxu0 %v354_v5  ;;  %422 = vmatpush.bf16.msra.mxu1 %v354_v5 }
  0x22   :  { %423 = vmatpush.bf16.msra.mxu2 %v354_v5  ;;  %424 = vmatpush.bf16.msra.mxu3 %v354_v5 }
  0x25   :  { %185 = vmatpush.bf16.msra.mxu0 %v353_v6  ;;  %425 = vmatpush.bf16.msra.mxu1 %v353_v6 }
  0x26   :  { %426 = vmatpush.bf16.msra.mxu2 %v353_v6  ;;  %427 = vmatpush.bf16.msra.mxu3 %v353_v6 }
  0x29   :  { %186 = vmatpush.bf16.msra.mxu0 %v352_v7  ;;  %428 = vmatpush.bf16.msra.mxu1 %v352_v7 }
  0x2a   :  { %429 = vmatpush.bf16.msra.mxu2 %v352_v7  ;;  %430 = vmatpush.bf16.msra.mxu3 %v352_v7 }
  0x2c   :  { %187 = vmatmul.bf16.vlgmr.msra.gmra.mxu0 %v344_v8  ;;  %197 = vmatmul.bf16.vlgmr.msra.gmra.mxu1 %v346_v9 }
  0x2d   :  { %207 = vmatmul.bf16.vlgmr.msra.gmra.mxu2 %v348_v10  ;;  %217 = vmatmul.bf16.vlgmr.msra.gmra.mxu3 %v350_v11 }
  0x3c   :  { %192 = vmatmul.bf16.gmra.mxu0 %v345_v12  ;;  %202 = vmatmul.bf16.gmra.mxu1 %v347_v13 }
  0x3d   :  { %212 = vmatmul.bf16.gmra.mxu2 %v349_v14  ;;  %222 = vmatmul.bf16.gmra.mxu3 %v351_v15 }
  0xa9   :  { %v188_v16 = vpop.f32.mrf.mxu0  ;;  %v198_v17 = vpop.f32.mrf.mxu1 }
  0xaa   :  { %v189_v23 = vadd.f32 %v436_v18, %v188_v16  ;;  %v199_v24 = vadd.f32 %v436_v18, %v198_v17 }
  0xb0   :  { %v208_v19 = vpop.f32.mrf.mxu2  ;;  %v218_v20 = vpop.f32.mrf.mxu3 }
  0xb1   :  { %v190_v21 = vpop.f32.mrf.mxu0  ;;  %v200_v22 = vpop.f32.mrf.mxu1  ;;  %v209_v31 = vadd.f32 %v436_v18, %v208_v19  ;;  %v219_v32 = vadd.f32 %v436_v18, %v218_v20 }
  0xb2   :  { %v191_v25 = vadd.f32 %v436_v18, %v190_v21  ;;  %v201_v26 = vadd.f32 %v436_v18, %v200_v22 }
  0xb4   :  { %v363_v27 = vpack.c.bf16 %v191_v25, %v189_v23  ;;  %v373_v28 = vpack.c.bf16 %v201_v26, %v199_v24 }
  0xb6   :  { %364 = vst [vmem:[#allocation7] sm:$0xff] %v363_v27  }
  0xb7   :  { %401 = vst [vmem:[#allocation7 + $0x10] sm:$0xff] %v373_v28  }
  0xb8   :  { %v210_v29 = vpop.f32.mrf.mxu2  ;;  %v220_v30 = vpop.f32.mrf.mxu3 }
  0xb9   :  { %v211_v33 = vadd.f32 %v436_v18, %v210_v29  ;;  %v221_v34 = vadd.f32 %v436_v18, %v220_v30  ;;  %v193_v35 = vpop.f32.mrf.mxu0  ;;  %v203_v36 = vpop.f32.mrf.mxu1 }
  0xba   :  { %v194_v43 = vadd.f32 %v436_v18, %v193_v35  ;;  %v204_v44 = vadd.f32 %v436_v18, %v203_v36 }
  0xbb   :  { %v383_v37 = vpack.c.bf16 %v211_v33, %v209_v31  ;;  %v393_v38 = vpack.c.bf16 %v221_v34, %v219_v32 }
  0xbd   :  { %403 = vst [vmem:[#allocation7 + $0x20] sm:$0xff] %v383_v37  }
  0xbe   :  { %405 = vst [vmem:[#allocation7 + $0x30] sm:$0xff] %v393_v38  }
  0xc0   :  { %v213_v39 = vpop.f32.mrf.mxu2  ;;  %v223_v40 = vpop.f32.mrf.mxu3 }
  0xc1   :  { %v195_v41 = vpop.f32.mrf.mxu0  ;;  %v205_v42 = vpop.f32.mrf.mxu1  ;;  %v214_v51 = vadd.f32 %v436_v18, %v213_v39  ;;  %v224_v52 = vadd.f32 %v436_v18, %v223_v40 }
  0xc2   :  { %v196_v45 = vadd.f32 %v436_v18, %v195_v41  ;;  %v206_v46 = vadd.f32 %v436_v18, %v205_v42 }
  0xc4   :  { %v368_v47 = vpack.c.bf16 %v196_v45, %v194_v43  ;;  %v378_v48 = vpack.c.bf16 %v206_v46, %v204_v44 }
  0xc6   :  { %400 = vst [vmem:[#allocation7 + $0x8] sm:$0xff] %v368_v47  }
  0xc7   :  { %402 = vst [vmem:[#allocation7 + $0x18] sm:$0xff] %v378_v48  }
  0xc8   :  { %v215_v49 = vpop.f32.mrf.mxu2  ;;  %v225_v50 = vpop.f32.mrf.mxu3 }
  0xc9   :  { %v216_v53 = vadd.f32 %v436_v18, %v215_v49  ;;  %v226_v54 = vadd.f32 %v436_v18, %v225_v50 }
  0xcb   :  { %v388_v55 = vpack.c.bf16 %v216_v53, %v214_v51  ;;  %v398_v56 = vpack.c.bf16 %v226_v54, %v224_v52 }
  0xcd   :  { %404 = vst [vmem:[#allocation7 + $0x28] sm:$0xff] %v388_v55  }
  0xce   :  { %406 = vst [vmem:[#allocation7 + $0x38] sm:$0xff] %v398_v56  }
  0xcf   :  { %272 = dma.vmem_to_hbm [thread:$0]  %s265_s24, 1024, %s267_s27, [#allocation4], %s516_s20, %s516_s20, %s517_s21  }
  0xd0   :  { %513 = dma.done.wait [#allocation4], 1024  }
  0xd1   :  { %514 = vsyncadd [#allocation4], 4294966272 }
  0xd2   :  { %277 = vsyncpa [#allocation3], 1 }
  0xd3   :  { %278 = vsyncpa [#allocation6], 1 }
  0xd4   :  { %279 = vsyncpa [#allocation4], 1 }

</bundles_post_ra>
